<compile_context>
chip_gen: v7x
topology: tpu7x:2x2x1
jax: 0.10.0
libtpu: 0.0.40
codegen_flags: <defaults>
</compile_context>

<pallas_src>
import jax
import jax.numpy as jnp
from jax.experimental import pallas as pl
from jax.experimental.pallas import tpu as pltpu

LAYER_DIMS = [(784, 50), (50, 40), (40, 30), (30, 20), (20, 10)]
FLOPS_PER_ROW = 2 * sum(fi * fo for fi, fo in LAYER_DIMS)  # = 86_400
NUM_CLASSES = 10
OUT_LANES = 128          # lane-dense output slab width
DEFAULT_TILE = 1024      # rows per grid step (bf16 x: ~1.6 MiB per buffer)


def five_layer_dense_kernel(
    x_ref,
    w1_ref, b1_ref,
    w2_ref, b2_ref,
    w3_ref, b3_ref,
    w4_ref, b4_ref,
    w5_ref, b5_ref,
    out_ref,
):
    x = x_ref[...]  # (TB, 784), bf16 (default) or f32 — no in-kernel cast

    # Layer 1: the only HBM-heavy matmul.  W1 was pre-cast to x's dtype in the
    # wrapper, so this is a single native MXU pass with f32 accumulation.
    h = jnp.dot(x, w1_ref[...], preferred_element_type=jnp.float32) + b1_ref[...]
    h = jnp.maximum(h, 0.0)

    # Tiny inner layers: f32 end-to-end (not the bottleneck).
    h = jnp.dot(h, w2_ref[...], preferred_element_type=jnp.float32) + b2_ref[...]
    h = jnp.maximum(h, 0.0)
    h = jnp.dot(h, w3_ref[...], preferred_element_type=jnp.float32) + b3_ref[...]
    h = jnp.maximum(h, 0.0)
    h = jnp.dot(h, w4_ref[...], preferred_element_type=jnp.float32) + b4_ref[...]
    h = jnp.maximum(h, 0.0)

    # Layer 5: W5/b5 are zero-padded to 128 output lanes in the wrapper, so
    # `logits` is already a lane-dense (TB, 128) block (real logits in lanes
    # 0..9, exact zeros in the pad lanes).
    logits = jnp.dot(h, w5_ref[...], preferred_element_type=jnp.float32) + b5_ref[...]

    # log_softmax over the 10 real classes only: mask pad lanes out of the
    # max / sum reductions (reducing over the zero pad lanes would corrupt
    # the max and the LSE).
    lane = jax.lax.broadcasted_iota(jnp.int32, logits.shape, 1)
    valid = lane < NUM_CLASSES
    m = jnp.max(jnp.where(valid, logits, -jnp.inf), axis=-1, keepdims=True)
    shifted = logits - m
    lse = jnp.log(jnp.sum(jnp.where(valid, jnp.exp(shifted), 0.0),
                          axis=-1, keepdims=True))
    # Full unmasked 128-lane store; pad lanes hold junk and are sliced off in
    # the wrapper.
    out_ref[...] = shifted - lse


def _round_up(a, m):
    return ((a + m - 1) // m) * m


def _choose_tiling(batch, tb, row_mult):
    """Tile = multiple of row_mult, <= tb, sized so the grid has >= 2 steps."""
    tb = max(row_mult, (tb // row_mult) * row_mult)
    tile = min(tb, _round_up(max(1, (batch + 1) // 2), row_mult))
    b_pad = max(_round_up(batch, tile), 2 * tile)
    return tile, b_pad


def init_params(key):
    """Deterministic init matching PyTorch nn.Linear shapes.

    PyTorch Linear(in, out) has weight (out, in), bias (out,), both
    U(-1/sqrt(in), 1/sqrt(in)).  We store W transposed as (in, out) and bias
    as (1, out) for clean broadcasting.
    """
    params = []
    for (fan_in, fan_out) in LAYER_DIMS:
        key, kw, kb = jax.random.split(key, 3)
        bound = 1.0 / jnp.sqrt(jnp.float32(fan_in))
        w = jax.random.uniform(kw, (fan_in, fan_out), jnp.float32, -bound, bound)
        b = jax.random.uniform(kb, (1, fan_out), jnp.float32, -bound, bound)
        params.append((w, b))
    return params


def five_layer_dense(x_nchw, params, *, tb=DEFAULT_TILE,
                     input_dtype=jnp.bfloat16, vmem_limit_bytes=None):
    B = x_nchw.shape[0]
    # nn.Flatten(): [B, C, H, W] -> [B, C*H*W] row-major (glue, outside kernel)
    x = x_nchw.reshape(B, -1).astype(input_dtype)
    assert x.shape[1] == 784, f"expected 784 features, got {x.shape[1]}"

    row_mult = 16 if input_dtype == jnp.bfloat16 else 8
    tile, b_pad = _choose_tiling(B, tb, row_mult)
    if b_pad != B:
        # Padded zero rows flow through to finite log-probs and are sliced off.
        x = jnp.pad(x, ((0, b_pad - B), (0, 0)))

    grid = (b_pad // tile,)

    # Weight/bias prep (layout glue, outside the kernel):
    #   * W1 pre-cast to the streaming dtype (bit-identical to an in-kernel
    #     cast, but done once instead of every grid step).
    #   * W5/b5 zero-padded 10 -> 128 output lanes for a lane-dense store.
    (w1, b1), (w2, b2), (w3, b3), (w4, b4), (w5, b5) = params
    w5p = jnp.pad(w5.astype(jnp.float32), ((0, 0), (0, OUT_LANES - NUM_CLASSES)))
    b5p = jnp.pad(b5.astype(jnp.float32), ((0, 0), (0, OUT_LANES - NUM_CLASSES)))
    flat_params = [
        w1.astype(input_dtype), b1.astype(jnp.float32),
        w2.astype(jnp.float32), b2.astype(jnp.float32),
        w3.astype(jnp.float32), b3.astype(jnp.float32),
        w4.astype(jnp.float32), b4.astype(jnp.float32),
        w5p, b5p,
    ]

    # x/out streamed per batch tile (double-buffered by the BlockSpec
    # pipeline); weights resident across the whole grid (constant index_map
    # => DMA'd once, reused every step).
    x_spec = pl.BlockSpec((tile, 784), lambda i: (i, 0))
    out_spec = pl.BlockSpec((tile, OUT_LANES), lambda i: (i, 0))
    param_specs = [pl.BlockSpec(p.shape, lambda i: (0, 0)) for p in flat_params]

    bytes_accessed = (
        b_pad * 784 * x.dtype.itemsize                     # x stream
        + b_pad * OUT_LANES * 4                            # padded output
        + sum(p.size * p.dtype.itemsize for p in flat_params)  # resident weights
    )
    cost = pl.CostEstimate(
        flops=int(b_pad * FLOPS_PER_ROW),
        transcendentals=int(b_pad * (OUT_LANES + 1)),  # exp over the slab + log
        bytes_accessed=int(bytes_accessed),
    )

    out = pl.pallas_call(
        five_layer_dense_kernel,
        out_shape=jax.ShapeDtypeStruct((b_pad, OUT_LANES), jnp.float32),
        grid=grid,
        in_specs=[x_spec] + param_specs,
        out_specs=out_spec,
        compiler_params=pltpu.CompilerParams(
            # Batch tiles are independent -> shard across TCs on v7x.
            dimension_semantics=("parallel",),
            vmem_limit_bytes=vmem_limit_bytes,
        ),
        cost_estimate=cost,
    )(x, *flat_params)

    return out[:B, :NUM_CLASSES]


def reference_forward(x_nchw, params):
    x = x_nchw.reshape(x_nchw.shape[0], -1).astype(jnp.float32)
    h = x
    for i, (w, b) in enumerate(params):
        h = h @ w + b
        if i < len(params) - 1:
            h = jnp.maximum(h, 0.0)
    return jax.nn.log_softmax(h, axis=1)


if __name__ == "__main__":
    key = jax.random.PRNGKey(0)
    key, kx = jax.random.split(key)

    # Input consistent with Linear(784, ...): [B, 1, 28, 28] NCHW
    x = jax.random.normal(kx, (2, 1, 28, 28), jnp.float32)
    params = init_params(key)
    ref = reference_forward(x, params)

    # 1) Default bf16-streamed path (x + W1 bf16, f32 accumulation everywhere).
    out = jax.block_until_ready(five_layer_dense(x, params))
    assert out.shape == (2, 10)
    assert bool(jnp.allclose(out, ref, atol=5e-2)), "bf16 path mismatch"

    # 2) f32-streamed path, multi-tile grid with batch padding (B=200, tb=64
    #    -> 4 grid steps). Tolerance accounts for TPU DEFAULT matmul precision
    #    / accumulation-order differences vs the XLA reference.
    key, kx2 = jax.random.split(key)
    x2 = jax.random.normal(kx2, (200, 1, 28, 28), jnp.float32)
    ref2 = reference_forward(x2, params)
    out2 = jax.block_until_ready(
        five_layer_dense(x2, params, tb=64, input_dtype=jnp.float32))
    assert out2.shape == (200, 10)
    assert bool(jnp.allclose(out2, ref2, atol=1e-2)), "f32 path mismatch"

    # 3) bf16 default at the same multi-tile shape.
    out3 = jax.block_until_ready(five_layer_dense(x2, params, tb=64))
    assert out3.shape == (200, 10)
    assert bool(jnp.allclose(out3, ref2, atol=6e-2)), "bf16 tiled mismatch"

    print("KERNEL_OK")
</pallas_src>

<mosaic_0001>
module attributes {stable_mosaic.version = 11 : i64} {
  func.func @five_layer_dense_kernel(%arg0: i32, %arg1: memref<16x784xbf16, #tpu.memory_space<vmem>>, %arg2: memref<784x50xbf16, #tpu.memory_space<vmem>>, %arg3: memref<1x50xf32, #tpu.memory_space<vmem>>, %arg4: memref<50x40xf32, #tpu.memory_space<vmem>>, %arg5: memref<1x40xf32, #tpu.memory_space<vmem>>, %arg6: memref<40x30xf32, #tpu.memory_space<vmem>>, %arg7: memref<1x30xf32, #tpu.memory_space<vmem>>, %arg8: memref<30x20xf32, #tpu.memory_space<vmem>>, %arg9: memref<1x20xf32, #tpu.memory_space<vmem>>, %arg10: memref<20x128xf32, #tpu.memory_space<vmem>>, %arg11: memref<1x128xf32, #tpu.memory_space<vmem>>, %arg12: memref<16x128xf32, #tpu.memory_space<vmem>>) attributes {dimension_semantics = [#tpu.dimension_semantics<parallel>], iteration_bounds = array<i64: 2>, scalar_prefetch = 0 : i64, scratch_operands = 0 : i64, tpu.core_type = #tpu.core_type<tc>, window_params = [{transform_indices = @transform_0, window_bounds = array<i64: 16, 784>}, {pipeline_mode = #tpu.pipeline_mode<synchronous>, transform_indices = @transform_1, window_bounds = array<i64: 784, 50>}, {pipeline_mode = #tpu.pipeline_mode<synchronous>, transform_indices = @transform_2, window_bounds = array<i64: 1, 50>}, {pipeline_mode = #tpu.pipeline_mode<synchronous>, transform_indices = @transform_3, window_bounds = array<i64: 50, 40>}, {pipeline_mode = #tpu.pipeline_mode<synchronous>, transform_indices = @transform_4, window_bounds = array<i64: 1, 40>}, {pipeline_mode = #tpu.pipeline_mode<synchronous>, transform_indices = @transform_5, window_bounds = array<i64: 40, 30>}, {pipeline_mode = #tpu.pipeline_mode<synchronous>, transform_indices = @transform_6, window_bounds = array<i64: 1, 30>}, {pipeline_mode = #tpu.pipeline_mode<synchronous>, transform_indices = @transform_7, window_bounds = array<i64: 30, 20>}, {pipeline_mode = #tpu.pipeline_mode<synchronous>, transform_indices = @transform_8, window_bounds = array<i64: 1, 20>}, {pipeline_mode = #tpu.pipeline_mode<synchronous>, transform_indices = @transform_9, window_bounds = array<i64: 20, 128>}, {pipeline_mode = #tpu.pipeline_mode<synchronous>, transform_indices = @transform_10, window_bounds = array<i64: 1, 128>}, {transform_indices = @transform_11, window_bounds = array<i64: 16, 128>}]} {
    %c0 = arith.constant 0 : index
    %c0_0 = arith.constant 0 : index
    %0 = vector.load %arg1[%c0, %c0_0] : memref<16x784xbf16, #tpu.memory_space<vmem>>, vector<16x784xbf16>
    %c0_1 = arith.constant 0 : index
    %c0_2 = arith.constant 0 : index
    %1 = vector.load %arg2[%c0_1, %c0_2] : memref<784x50xbf16, #tpu.memory_space<vmem>>, vector<784x50xbf16>
    %cst = arith.constant dense<0.000000e+00> : vector<16x50xf32>
    %2 = tpu.matmul %0, %1, %cst {dimension_numbers = #tpu.dot_dimension_numbers<[1], [0], [0], [1], [0, 0, 1, 1], [], []>} : vector<16x784xbf16>, vector<784x50xbf16>, vector<16x50xf32> -> vector<16x50xf32>
    %c0_3 = arith.constant 0 : index
    %c0_4 = arith.constant 0 : index
    %3 = vector.load %arg3[%c0_3, %c0_4] : memref<1x50xf32, #tpu.memory_space<vmem>>, vector<1x50xf32>
    %4 = vector.broadcast %3 : vector<1x50xf32> to vector<16x50xf32>
    %5 = arith.addf %2, %4 : vector<16x50xf32>
    %cst_5 = arith.constant 0.000000e+00 : f32
    %6 = vector.broadcast %cst_5 : f32 to vector<16x50xf32>
    %7 = arith.maximumf %5, %6 : vector<16x50xf32>
    %c0_6 = arith.constant 0 : index
    %c0_7 = arith.constant 0 : index
    %8 = vector.load %arg4[%c0_6, %c0_7] : memref<50x40xf32, #tpu.memory_space<vmem>>, vector<50x40xf32>
    %cst_8 = arith.constant dense<0.000000e+00> : vector<16x40xf32>
    %9 = tpu.matmul %7, %8, %cst_8 {dimension_numbers = #tpu.dot_dimension_numbers<[1], [0], [0], [1], [0, 0, 1, 1], [], []>} : vector<16x50xf32>, vector<50x40xf32>, vector<16x40xf32> -> vector<16x40xf32>
    %c0_9 = arith.constant 0 : index
    %c0_10 = arith.constant 0 : index
    %10 = vector.load %arg5[%c0_9, %c0_10] : memref<1x40xf32, #tpu.memory_space<vmem>>, vector<1x40xf32>
    %11 = vector.broadcast %10 : vector<1x40xf32> to vector<16x40xf32>
    %12 = arith.addf %9, %11 : vector<16x40xf32>
    %cst_11 = arith.constant 0.000000e+00 : f32
    %13 = vector.broadcast %cst_11 : f32 to vector<16x40xf32>
    %14 = arith.maximumf %12, %13 : vector<16x40xf32>
    %c0_12 = arith.constant 0 : index
    %c0_13 = arith.constant 0 : index
    %15 = vector.load %arg6[%c0_12, %c0_13] : memref<40x30xf32, #tpu.memory_space<vmem>>, vector<40x30xf32>
    %cst_14 = arith.constant dense<0.000000e+00> : vector<16x30xf32>
    %16 = tpu.matmul %14, %15, %cst_14 {dimension_numbers = #tpu.dot_dimension_numbers<[1], [0], [0], [1], [0, 0, 1, 1], [], []>} : vector<16x40xf32>, vector<40x30xf32>, vector<16x30xf32> -> vector<16x30xf32>
    %c0_15 = arith.constant 0 : index
    %c0_16 = arith.constant 0 : index
    %17 = vector.load %arg7[%c0_15, %c0_16] : memref<1x30xf32, #tpu.memory_space<vmem>>, vector<1x30xf32>
    %18 = vector.broadcast %17 : vector<1x30xf32> to vector<16x30xf32>
    %19 = arith.addf %16, %18 : vector<16x30xf32>
    %cst_17 = arith.constant 0.000000e+00 : f32
    %20 = vector.broadcast %cst_17 : f32 to vector<16x30xf32>
    %21 = arith.maximumf %19, %20 : vector<16x30xf32>
    %c0_18 = arith.constant 0 : index
    %c0_19 = arith.constant 0 : index
    %22 = vector.load %arg8[%c0_18, %c0_19] : memref<30x20xf32, #tpu.memory_space<vmem>>, vector<30x20xf32>
    %cst_20 = arith.constant dense<0.000000e+00> : vector<16x20xf32>
    %23 = tpu.matmul %21, %22, %cst_20 {dimension_numbers = #tpu.dot_dimension_numbers<[1], [0], [0], [1], [0, 0, 1, 1], [], []>} : vector<16x30xf32>, vector<30x20xf32>, vector<16x20xf32> -> vector<16x20xf32>
    %c0_21 = arith.constant 0 : index
    %c0_22 = arith.constant 0 : index
    %24 = vector.load %arg9[%c0_21, %c0_22] : memref<1x20xf32, #tpu.memory_space<vmem>>, vector<1x20xf32>
    %25 = vector.broadcast %24 : vector<1x20xf32> to vector<16x20xf32>
    %26 = arith.addf %23, %25 : vector<16x20xf32>
    %cst_23 = arith.constant 0.000000e+00 : f32
    %27 = vector.broadcast %cst_23 : f32 to vector<16x20xf32>
    %28 = arith.maximumf %26, %27 : vector<16x20xf32>
    %c0_24 = arith.constant 0 : index
    %c0_25 = arith.constant 0 : index
    %29 = vector.load %arg10[%c0_24, %c0_25] : memref<20x128xf32, #tpu.memory_space<vmem>>, vector<20x128xf32>
    %cst_26 = arith.constant dense<0.000000e+00> : vector<16x128xf32>
    %30 = tpu.matmul %28, %29, %cst_26 {dimension_numbers = #tpu.dot_dimension_numbers<[1], [0], [0], [1], [0, 0, 1, 1], [], []>} : vector<16x20xf32>, vector<20x128xf32>, vector<16x128xf32> -> vector<16x128xf32>
    %c0_27 = arith.constant 0 : index
    %c0_28 = arith.constant 0 : index
    %31 = vector.load %arg11[%c0_27, %c0_28] : memref<1x128xf32, #tpu.memory_space<vmem>>, vector<1x128xf32>
    %32 = vector.broadcast %31 : vector<1x128xf32> to vector<16x128xf32>
    %33 = arith.addf %30, %32 : vector<16x128xf32>
    %34 = tpu.iota {dimensions = array<i32: 1>} : vector<16x128xi32>
    %c10_i32 = arith.constant 10 : i32
    %35 = vector.broadcast %c10_i32 : i32 to vector<16x128xi32>
    %36 = arith.cmpi slt, %34, %35 : vector<16x128xi32>
    %cst_29 = arith.constant 0xFF800000 : f32
    %37 = vector.broadcast %cst_29 : f32 to vector<16x128xf32>
    %38 = arith.select %36, %33, %37 : vector<16x128xi1>, vector<16x128xf32>
    %cst_30 = arith.constant dense<0xFF800000> : vector<16xf32>
    %39 = vector.multi_reduction <maximumf>, %38, %cst_30 [1] : vector<16x128xf32> to vector<16xf32>
    %40 = vector.shape_cast %39 : vector<16xf32> to vector<16x1xf32>
    %41 = vector.broadcast %40 : vector<16x1xf32> to vector<16x128xf32>
    %42 = arith.subf %33, %41 : vector<16x128xf32>
    %43 = math.exp %42 : vector<16x128xf32>
    %cst_31 = arith.constant 0.000000e+00 : f32
    %44 = vector.broadcast %cst_31 : f32 to vector<16x128xf32>
    %45 = arith.select %36, %43, %44 : vector<16x128xi1>, vector<16x128xf32>
    %cst_32 = arith.constant dense<0.000000e+00> : vector<16xf32>
    %46 = vector.multi_reduction <add>, %45, %cst_32 [1] : vector<16x128xf32> to vector<16xf32>
    %47 = vector.shape_cast %46 : vector<16xf32> to vector<16x1xf32>
    %48 = math.log %47 : vector<16x1xf32>
    %49 = vector.broadcast %48 : vector<16x1xf32> to vector<16x128xf32>
    %50 = arith.subf %42, %49 : vector<16x128xf32>
    %c0_33 = arith.constant 0 : index
    %c0_34 = arith.constant 0 : index
    %51 = vector.load %arg12[%c0_33, %c0_34] : memref<16x128xf32, #tpu.memory_space<vmem>>, vector<16x128xf32>
    tpu.vector_store %arg12[%c0_33, %c0_34], %50 {strides = array<i32>} : memref<16x128xf32, #tpu.memory_space<vmem>>, vector<16x128xf32>,
    return
  }
  func.func @transform_0(%arg0: i32) -> (i32, i32) {
    %c0_i32 = arith.constant 0 : i32
    %c0_i32_0 = arith.constant 0 : i32
    return %arg0, %c0_i32 : i32, i32
  }
  func.func @transform_1(%arg0: i32) -> (i32, i32) {
    %c0_i32 = arith.constant 0 : i32
    %c0_i32_0 = arith.constant 0 : i32
    %c0_i32_1 = arith.constant 0 : i32
    return %c0_i32, %c0_i32_0 : i32, i32
  }
  func.func @transform_2(%arg0: i32) -> (i32, i32) {
    %c0_i32 = arith.constant 0 : i32
    %c0_i32_0 = arith.constant 0 : i32
    %c0_i32_1 = arith.constant 0 : i32
    return %c0_i32, %c0_i32_0 : i32, i32
  }
  func.func @transform_3(%arg0: i32) -> (i32, i32) {
    %c0_i32 = arith.constant 0 : i32
    %c0_i32_0 = arith.constant 0 : i32
    %c0_i32_1 = arith.constant 0 : i32
    return %c0_i32, %c0_i32_0 : i32, i32
  }
  func.func @transform_4(%arg0: i32) -> (i32, i32) {
    %c0_i32 = arith.constant 0 : i32
    %c0_i32_0 = arith.constant 0 : i32
    %c0_i32_1 = arith.constant 0 : i32
    return %c0_i32, %c0_i32_0 : i32, i32
  }
  func.func @transform_5(%arg0: i32) -> (i32, i32) {
    %c0_i32 = arith.constant 0 : i32
    %c0_i32_0 = arith.constant 0 : i32
    %c0_i32_1 = arith.constant 0 : i32
    return %c0_i32, %c0_i32_0 : i32, i32
  }
  func.func @transform_6(%arg0: i32) -> (i32, i32) {
    %c0_i32 = arith.constant 0 : i32
    %c0_i32_0 = arith.constant 0 : i32
    %c0_i32_1 = arith.constant 0 : i32
    return %c0_i32, %c0_i32_0 : i32, i32
  }
  func.func @transform_7(%arg0: i32) -> (i32, i32) {
    %c0_i32 = arith.constant 0 : i32
    %c0_i32_0 = arith.constant 0 : i32
    %c0_i32_1 = arith.constant 0 : i32
    return %c0_i32, %c0_i32_0 : i32, i32
  }
  func.func @transform_8(%arg0: i32) -> (i32, i32) {
    %c0_i32 = arith.constant 0 : i32
    %c0_i32_0 = arith.constant 0 : i32
    %c0_i32_1 = arith.constant 0 : i32
    return %c0_i32, %c0_i32_0 : i32, i32
  }
  func.func @transform_9(%arg0: i32) -> (i32, i32) {
    %c0_i32 = arith.constant 0 : i32
    %c0_i32_0 = arith.constant 0 : i32
    %c0_i32_1 = arith.constant 0 : i32
    return %c0_i32, %c0_i32_0 : i32, i32
  }
  func.func @transform_10(%arg0: i32) -> (i32, i32) {
    %c0_i32 = arith.constant 0 : i32
    %c0_i32_0 = arith.constant 0 : i32
    %c0_i32_1 = arith.constant 0 : i32
    return %c0_i32, %c0_i32_0 : i32, i32
  }
  func.func @transform_11(%arg0: i32) -> (i32, i32) {
    %c0_i32 = arith.constant 0 : i32
    %c0_i32_0 = arith.constant 0 : i32
    return %arg0, %c0_i32 : i32, i32
  }
}

</mosaic_0001>

<bundles_post_ra>
// kernel: tpu_custom_call.1
= control target key start
LH: loop header
LB: loop body
LE: loop exit
PB: predicated region body
PF: predicated region fallthrough
CT: control target
= control target key end

     0   :  { %16 = vsyncpa [#allocation3], 0  ;;  %s2349_s0 = inlined_call_operand.vmem [shape: bf16[32,784], index: 0, kind: input, shape index: {}]   ;;  %s2350_s1 = inlined_call_operand.vmem [shape: bf16[784,50], index: 1, kind: input, shape index: {}]   ;;  %s2351_s2 = inlined_call_operand.vmem [shape: f32[1,50], index: 2, kind: input, shape index: {}]   ;;  %s2352_s3 = inlined_call_operand.vmem [shape: f32[50,40], index: 3, kind: input, shape index: {}]   ;;  %s2353_s4 = inlined_call_operand.vmem [shape: f32[1,40], index: 4, kind: input, shape index: {}]   ;;  %s2354_s5 = inlined_call_operand.vmem [shape: f32[40,30], index: 5, kind: input, shape index: {}]   ;;  %s2355_s6 = inlined_call_operand.vmem [shape: f32[1,30], index: 6, kind: input, shape index: {}]   ;;  %s2356_s7 = inlined_call_operand.vmem [shape: f32[30,20], index: 7, kind: input, shape index: {}]   ;;  %s2357_s8 = inlined_call_operand.vmem [shape: f32[1,20], index: 8, kind: input, shape index: {}]   ;;  %s2358_s9 = inlined_call_operand.vmem [shape: f32[20,128], index: 9, kind: input, shape index: {}]   ;;  %s2359_s10 = inlined_call_operand.vmem [shape: f32[1,128], index: 10, kind: input, shape index: {}]   ;;  %s2360_s11 = inlined_call_operand.hbm [shape: f32[32,128], index: 11, kind: output, shape index: {}]  }
   0x1   :  { %18 = vsyncpa [#allocation3 + $0x1], 0  ;;  %s2015_s17 = smov 0   ;;  %s2017_s18 = smov 0  }
   0x2   :  { %s2019_s19 = smov 0   ;;  %s2021_s20 = smov 0  }
   0x3 LB: > { %s2036_s21 = sadd.s32 4294967295, %s1947_s20   ;;  %s1502_s22 = sadd.s32 4294967294, %s1947_s20   ;;  %s1947_s20 = sphi %s2021_s20, %s2368_s20   ;;  %s1943_s19 = sphi %s2019_s19, %s2367_s19   ;;  %s1939_s18 = sphi %s2017_s18, %s2366_s18   ;;  %s1935_s17 = sphi %s2015_s17, %s2365_s17  }
   0x4   : > { %s2040_s23 = sadd.s32 1, %s1947_s20   ;;  %s267_s24 = sadd.s32 1, %s1943_s19 }
   0x5   : > { %s264_s25 = ssub.s32 %s1947_s20, %s2040_s23  ;;  %p277_p0 = scmp.ne.s32.totalorder %s1943_s19, %s1939_s18 }
   0x6   : > { %p265_p1 = scmp.eq.s32.totalorder %s264_s25, 0  ;;  %p278_p2 = scmp.eq.s32.totalorder %s2036_s21, 1 }
   0x7   : > { %p283_p3 = scmp.ne.s32.totalorder %s1939_s18, %s1935_s17  ;;  %p284_p4 = scmp.eq.s32.totalorder %s1502_s22, 1 }
   0x8   : > { %s2051_s26 = scalar_select %p265_p1, %s1943_s19, %s267_s24  }
   0x9   : > { %p2053_p5 = por %p278_p2, %p277_p0  ;;  %p2057_p6 = por %p284_p4, %p283_p3 }
   0xa   : > { %2361 = sst [smem:[#allocation5_spill]] %s2051_s26  ;;  %p1505_p7 = scmp.ge.s32.totalorder %s1947_s20, 1 }
   0xb   : > { %p342_p8 = scmp.lt.s32.totalorder %s1947_s20, 3 }
   0xd   : > { %p343_p9 = pnand %p1505_p7, %p342_p8 }
   0xe   : > { %v1818_v0 = vld [vmem:[%s2350_s1 + $0x40] sm:$0xff] (!%p343_p9)   ;;  %v1822_v4 = vld [vmem:[%s2350_s1 + $0x48] sm:$0xff] (!%p343_p9)   ;;  %v1826_v8 = vld [vmem:[%s2350_s1 + $0x50] sm:$0xff] (!%p343_p9)   ;;  %s1507_s24 = sshll.u32 (!%p343_p9), %s2036_s21, 1  ;;  %v1949_v38 = vmov (!%p343_p9), 0.0   ;;  %vm1950_vm0 = vmmov (!%p343_p9), 0  }
   0xf   : > { %346 = sbr.rel (%p343_p9) target bundleno = 1506 (0x5e2), region = 64  ;;  %v1819_v1 = vld [vmem:[%s2350_s1] sm:$0xff] (!%p343_p9)   ;;  %1588 = vmatprep.subr.bf16.mxu0 (!%p343_p9), %v1818_v0  ;;  %v1823_v5 = vld [vmem:[%s2350_s1 + $0x8] sm:$0xff] (!%p343_p9)   ;;  %v1827_v9 = vld [vmem:[%s2350_s1 + $0x10] sm:$0xff] (!%p343_p9)   ;;  %p384_p10 = scmp.lt.s32.totalorder (!%p343_p9), %s1507_s24, 3  ;;  %vm834_vm1 = vcmask (!%p343_p9), 130048  }
  0x10   : > { %v1820_v2 = vld [vmem:[%s2350_s1 + $0xc0] sm:$0xff] (!%p343_p9)   ;;  %1589 = vmatpush3.bf16.msra.mxu0 (!%p343_p9), %v1819_v1  ;;  %v1824_v6 = vld [vmem:[%s2350_s1 + $0xc8] sm:$0xff] (!%p343_p9)   ;;  %v1828_v10 = vld [vmem:[%s2350_s1 + $0xd0] sm:$0xff] (!%p343_p9)   ;;  %vm1025_vm2 = vcmask (!%p343_p9), 1041408   ;;  %vm1018_vm3 = vcmask (!%p343_p9), 408576   ;;  %vm1118_vm4 = vcmask (!%p343_p9), 326656  }
  0x11   : > { %v1821_v3 = vld [vmem:[%s2350_s1 + $0x80] sm:$0xff] (!%p343_p9)   ;;  %1610 = vmatprep.subr.bf16.mxu1 (!%p343_p9), %v1820_v2  ;;  %1590 = vmatprep.subr.bf16.mxu0 (!%p343_p9), %v1822_v4  ;;  %v1825_v7 = vld [vmem:[%s2350_s1 + $0x88] sm:$0xff] (!%p343_p9)   ;;  %v1829_v11 = vld [vmem:[%s2350_s1 + $0x90] sm:$0xff] (!%p343_p9)   ;;  %vm1220_vm5 = vcmask (!%p343_p9), 1045504   ;;  %vm1951_vm6 = vmmov (!%p343_p9), 1   ;;  %vm1213_vm8 = vcmask (!%p343_p9), 244736  }
  0x12   : > { %1611 = vmatpush3.bf16.msra.mxu1 (!%p343_p9), %v1821_v3  ;;  %v1830_v12 = vld [vmem:[%s2350_s1 + $0x58] sm:$0xff] (!%p343_p9)   ;;  %v1834_v16 = vld [vmem:[%s2350_s1 + $0x60] sm:$0xff] (!%p343_p9)   ;;  %v1838_v20 = vld [vmem:[%s2350_s1 + $0x68] sm:$0xff] (!%p343_p9)   ;;  %vm1318_vm9 = vcmask (!%p343_p9), 1043456   ;;  %vm1311_vm10 = vcmask (!%p343_p9), 162816  }
  0x13   : > { %1612 = vmatprep.subr.bf16.mxu1 (!%p343_p9), %v1824_v6  ;;  %v1831_v13 = vld [vmem:[%s2350_s1 + $0x18] sm:$0xff] (!%p343_p9)   ;;  %v1835_v17 = vld [vmem:[%s2350_s1 + $0x20] sm:$0xff] (!%p343_p9)   ;;  %v1839_v21 = vld [vmem:[%s2350_s1 + $0x28] sm:$0xff] (!%p343_p9)  }
  0x14   : > { %1591 = vmatpush3.bf16.msra.mxu0 (!%p343_p9), %v1823_v5  ;;  %v1832_v14 = vld [vmem:[%s2350_s1 + $0xd8] sm:$0xff] (!%p343_p9)   ;;  %v1836_v18 = vld [vmem:[%s2350_s1 + $0xe0] sm:$0xff] (!%p343_p9)   ;;  %v1840_v22 = vld [vmem:[%s2350_s1 + $0xe8] sm:$0xff] (!%p343_p9)  }
  0x15   : > { %1592 = vmatprep.subr.bf16.mxu0 (!%p343_p9), %v1826_v8  ;;  %v1833_v15 = vld [vmem:[%s2350_s1 + $0x98] sm:$0xff] (!%p343_p9)   ;;  %v1837_v19 = vld [vmem:[%s2350_s1 + $0xa0] sm:$0xff] (!%p343_p9)   ;;  %v1841_v23 = vld [vmem:[%s2350_s1 + $0xa8] sm:$0xff] (!%p343_p9)  }
  0x16   : > { %1613 = vmatpush3.bf16.msra.mxu1 %v1825_v7  ;;  %s2370_s24 = smov (!%p384_p10, %s1507_s24), 3  ;;  %v1842_v24 = vld [vmem:[%s2350_s1 + $0x70] sm:$0xff]   ;;  %v1846_v28 = vld [vmem:[%s2350_s1 + $0x78] sm:$0xff]   ;;  %v1853_v34 = vld [vmem:[%s2350_s1 + $0x140] sm:$0xff]  }
  0x17   : > { %1614 = vmatprep.subr.bf16.mxu1 %v1828_v10  ;;  %s1773_s13 = smul.u32 28, %s2370_s24  ;;  %v1843_v25 = vld [vmem:[%s2350_s1 + $0x30] sm:$0xff]   ;;  %v1847_v29 = vld [vmem:[%s2350_s1 + $0x38] sm:$0xff]   ;;  %v1857_v37 = vld [vmem:[%s2350_s1 + $0x100] sm:$0xff]  }
  0x18   : > { %1593 = vmatpush3.bf16.msra.mxu0 %v1827_v9  ;;  %v1844_v26 = vld [vmem:[%s2350_s1 + $0xf0] sm:$0xff]   ;;  %v1848_v30 = vld [vmem:[%s2350_s1 + $0xf8] sm:$0xff]   ;;  %v1858_v39 = vld [vmem:[%s2350_s1 + $0x148] sm:$0xff]  }
  0x19   : > { %1594 = vmatprep.subr.bf16.mxu0 %v1830_v12  ;;  %v1845_v27 = vld [vmem:[%s2350_s1 + $0xb0] sm:$0xff]   ;;  %s2154_s26 = scalar_lea.vmem %s2349_s0, %s1773_s13  ;;  %v1852_v33 = vld [vmem:[%s2350_s1 + $0xb8] sm:$0xff]   ;;  %v1859_v40 = vld [vmem:[%s2350_s1 + $0x108] sm:$0xff]   ;;  %s380_s13 = sand.u32 1, %s1939_s18  }
  0x1a   : > { %1615 = vmatpush3.bf16.msra.mxu1 %v1829_v11  ;;  %v1849_v31 = vld [vmem:[%s2154_s26] ss:$28 sps:$4 sm:$0xff]   ;;  %v1854_v35 = vld [vmem:[%s2154_s26 + $0x8] ss:$28 sps:$4 sm:$0xff]   ;;  %v1860_v41 = vld [vmem:[%s2350_s1 + $0x150] sm:$0xff]   ;;  %s1506_s25 = sshll.u32 %s380_s13, 4 }
  0x1b   : > { %1616 = vmatprep.subr.bf16.mxu1 %v1832_v14  ;;  %v1851_v32 = vld [vmem:[%s2154_s26 + $0x4] ss:$28 sps:$4 sm:$0xff]   ;;  %v1856_v36 = vld [vmem:[%s2154_s26 + $0xc] ss:$28 sps:$4 sm:$0xff]   ;;  %v1861_v42 = vld [vmem:[%s2350_s1 + $0x110] sm:$0xff]   ;;  %s382_s29 = scalar_lea.vmem [#allocation2], %s1506_s25 }
  0x1c   : > { %1595 = vmatpush3.bf16.msra.mxu0 %v1831_v13  ;;  %870 = vmatprep.mubr.bf16.mxu0 %v1851_v32  ;;  %v1862_v43 = vld [vmem:[%s2350_s1 + $0x158] sm:$0xff]   ;;  %v1864_v45 = vld [vmem:[%s2350_s1 + $0x160] sm:$0xff]   ;;  %v1866_v47 = vld [vmem:[%s2350_s1 + $0x168] sm:$0xff]   ;;  %s1440_s30 = sshll.u32 %s382_s29, 4  ;;  %s2308_s15 = scalar_lea.sflag [#allocation3], %s380_s13  ;;  %s2306_s30 = int_to_ptr.vmem [resolvable:$true] %s1440_s30 }
  0x1d   : > { %1596 = vmatprep.subr.bf16.mxu0 %v1834_v16  ;;  %911 = vmatprep.mubr.bf16.mxu1 %v1856_v36  ;;  %v1863_v44 = vld [vmem:[%s2350_s1 + $0x118] sm:$0xff]   ;;  %v1865_v46 = vld [vmem:[%s2350_s1 + $0x120] sm:$0xff]   ;;  %v1875_v49 = vld [vmem:[%s2154_s26 + $0x14] ss:$28 sps:$4 sm:$0xff]   ;;  %s1885_s16 = scalar_lea.vmem %s2306_s30, 256 }
  0x1e   : > { %1617 = vmatpush3.bf16.msra.mxu1 %v1833_v15  ;;  %v1872_v48 = vld [vmem:[%s2350_s1 + $0x180] sm:$0xff]   ;;  %v1876_v50 = vld [vmem:[%s2154_s26 + $0x18] ss:$28 sps:$4 sm:$0xff]   ;;  %v1867_v51 = vld [vmem:[%s2350_s1 + $0x128] sm:$0xff]   ;;  %p1886_p11 = scmp.ne.s32.totalorder %s2306_s30, %s1885_s16 }
  0x1f   : > { %1618 = vmatprep.subr.bf16.mxu1 %v1836_v18  ;;  %v1868_v52 = vld [vmem:[%s2350_s1 + $0x170] sm:$0xff]   ;;  %v1870_v54 = vld [vmem:[%s2350_s1 + $0x178] sm:$0xff]   ;;  %v1004_v57 = vld [vmem:[%s2352_s3] sm:$0xff] }
  0x20   : > { %1597 = vmatpush3.bf16.msra.mxu0 %v1835_v17  ;;  %v1869_v53 = vld [vmem:[%s2350_s1 + $0x130] sm:$0xff]   ;;  %v1871_v55 = vld [vmem:[%s2350_s1 + $0x138] sm:$0xff]   ;;  %v1005_v58 = vld [vmem:[%s2352_s3 + $0x8] sm:$0xff]  ;;  %p1887_p12 = pnand %p1886_p11, %p2053_p5 }
  0x21   : > { %1598 = vmatprep.subr.bf16.mxu0 %v1838_v20  ;;  %v1873_v56 = vld [vmem:[%s2154_s26 + $0x10] ss:$28 sps:$4 sm:$0xff]   ;;  %v1739_v59 = vpack.c.bf16 %v1005_v58, %v1004_v57  ;;  %v1007_v61 = vld [vmem:[%s2352_s3 + $0x18] sm:$0xff]  ;;  %v1008_v63 = vld [vmem:[%s2352_s3 + $0x20] sm:$0xff]  ;;  %s1587_s26 = sshll.u32 %s2036_s21, 8  ;;  %s1952_s21 = smov [#allocation2]  }
  0x22   : > { %1619 = vmatpush3.bf16.msra.mxu1 %v1837_v19  ;;  %v1006_v60 = vld [vmem:[%s2352_s3 + $0x10] sm:$0xff]  ;;  %v1009_v0 = vld [vmem:[%s2352_s3 + $0x28] sm:$0xff]  ;;  %v1106_v3 = vld [vmem:[%s2354_s5] sm:$0xff]  ;;  %s2304_s14 = scalar_lea.hbm %s2360_s11, %s1587_s26  ;;  %p1888_p13 = pneg %p1887_p12 }
  0x23   : > { %1620 = vmatprep.subr.bf16.mxu1 %v1840_v22  ;;  %v1743_v62 = vpack.c.bf16 %v1007_v61, %v1006_v60  ;;  %v1747_v1 = vpack.c.bf16 %v1009_v0, %v1008_v63  ;;  %v1010_v2 = vld [vmem:[%s2352_s3 + $0x30] sm:$0x3]  ;;  %v1107_v4 = vld [vmem:[%s2354_s5 + $0x8] sm:$0xff]  ;;  %v1509_v7 = vld [vmem:[%s2351_s2] ss:$0 sm:$0xff]  ;;  %s1889_s22 = sshll.u32 %s1952_s21, 4  ;;  %s1890_s22 = int_to_ptr.vmem [resolvable:$false] %s1889_s22 }
  0x24   : > { %1599 = vmatpush3.bf16.msra.mxu0 %v1839_v21  ;;  %v1751_v5 = vpack.c.bf16 %v1107_v4, %v1106_v3  ;;  %vm1764_vm7 = vmpackc.low %vm1220_vm5, %vm1951_vm6  ;;  %v1301_v63 = vld [vmem:[%s2358_s9] sm:$0xff]  ;;  %v1302_v0 = vld [vmem:[%s2358_s9 + $0x8] sm:$0xff]  ;;  %s1891_s25 = scalar_lea.vmem %s1890_s22, 512  ;;  %p1892_p0 = scmp.lt.s32.totalorder %s2306_s30, %s1890_s22 }
  0x25   : > { %1600 = vmatprep.subr.bf16.mxu0 %v1842_v24  ;;  %v1574_v3 = vld [vmem:[%s2357_s8] ss:$0 sm:$0xff]  ;;  %p1893_p1 = scmp.lt.s32.totalorder %s1891_s25, %s1885_s16 }
  0x26   : > { %1621 = vmatpush3.bf16.msra.mxu1 %v1841_v23 }
  0x27   : > { %1622 = vmatprep.subr.bf16.mxu1 %v1844_v26  ;;  %p1894_p2 = por %p1893_p1, %p1892_p0 }
  0x28   : > { %1601 = vmatpush3.bf16.msra.mxu0 %v1843_v25 }
  0x29   : > { %1602 = vmatprep.subr.bf16.mxu0 %v1846_v28  ;;  %p1895_p3 = pnand %p1894_p2, %p1888_p13 }
  0x2a   : > { %1623 = vmatpush3.bf16.msra.mxu1 %v1845_v27 }
  0x2b   : > { %1624 = vmatprep.subr.bf16.mxu1 %v1848_v30 }
  0x2c   : > { %1603 = vmatpush3.bf16.msra.mxu0 %v1847_v29 }
  0x2d   : > { %1632 = vmatprep.subr.bf16.mxu0 %v1853_v34 }
  0x2e   : > { %1625 = vmatpush3.bf16.msra.mxu1 %v1852_v33 }
  0x2f   : > { %871 = vmatmul.mubr.bf16.vlgmr.msra.gmra.mrb[0].mxu0 %v1849_v31  ;;  %1683 = vmatprep.subr.bf16.mxu1 %v1949_v38 }
  0x30   : > { %1633 = vmatpush3.bf16.msra.mxu0 %v1857_v37  ;;  %952 = vmatprep.mubr.bf16.mxu0 %v1875_v49 }
  0x31   : > { %912 = vmatmul.mubr.bf16.vlgmr.msra.gmra.mrb[0].mxu1 %v1854_v35  ;;  %1634 = vmatprep.subr.bf16.mxu0 %v1858_v39  ;;  %v1108_v39 = vld [vmem:[%s2354_s5 + $0x10] sm:$0xff] }
  0x32   : > { %1685 = vmatprep.mubr.msk.bf16.mxu1 %vm1950_vm0, %v1949_v38  ;;  %1684 = vmatpush3.bf16.msra.mxu1 %v1872_v48 }
  0x33   : > { %1740 = vmatprep.subr.bf16.mxu1 %v1739_v59 }
  0x34   : > { %1635 = vmatpush3.bf16.msra.mxu0 %v1859_v40  ;;  %v1109_v40 = vld [vmem:[%s2354_s5 + $0x18] sm:$0xff] }
  0x35   : > { %1636 = vmatprep.subr.bf16.mxu0 %v1860_v41  ;;  %v1755_v41 = vpack.c.bf16 %v1109_v40, %v1108_v39 }
  0x38   : > { %1637 = vmatpush3.bf16.msra.mxu0 %v1861_v42  ;;  %v1110_v42 = vld [vmem:[%s2354_s5 + $0x20] sm:$0xff] }
  0x39   : > { %1638 = vmatprep.subr.bf16.mxu0 %v1862_v43  ;;  %1686 = vmatmul.mubr.msk.bf16.vlgmr.msra.gmra.mrb[4].mxu1 %vm834_vm1, %v1876_v50  ;;  %v1202_v43 = vld [vmem:[%s2356_s7] sm:$0xff] }
  0x3a   : > { %1742 = vmatpush3.bf16.msra.mxu1 %v1739_v59 }
  0x3b   : > { %1744 = vmatprep.subr.bf16.mxu1 %v1743_v62 }
  0x3c   : > { %1639 = vmatpush3.bf16.msra.mxu0 %v1863_v44  ;;  %v1203_v44 = vld [vmem:[%s2356_s7 + $0x8] sm:$0xff] }
  0x3d   : > { %1640 = vmatprep.subr.bf16.mxu0 %v1864_v45  ;;  %v1759_v45 = vpack.c.bf16 %v1203_v44, %v1202_v43 }
  0x3e   : > { %1746 = vmatpush3.bf16.msra.mxu1 %v1743_v62 }
  0x3f   : > { %1748 = vmatprep.subr.bf16.mxu1 %v1747_v1 }
  0x40   : > { %1641 = vmatpush3.bf16.msra.mxu0 %v1865_v46  ;;  %v1567_v46 = vld [vmem:[%s2353_s4] ss:$0 sm:$0xff] }
  0x41   : > { %1642 = vmatprep.subr.bf16.mxu0 %v1866_v47 }
  0x42   : > { %1750 = vmatpush3.bf16.msra.mxu1 %v1747_v1  ;;  %v1769_v1 = vpack.c.bf16 %v1302_v0, %v1301_v63 }
  0x43   : > { %1701 = vmatprep.subr.msk.mxu1 %vm1025_vm2, %v1010_v2 }
  0x44   : > { %1643 = vmatpush3.bf16.msra.mxu0 %v1867_v51 }
  0x45   : > { %1644 = vmatprep.subr.bf16.mxu0 %v1868_v52 }
  0x46   : > { %1702 = vmatpush3.msk.msra.mxu1 %vm1025_vm2, %v1010_v2  ;;  %v1303_v2 = vld [vmem:[%s2358_s9 + $0x10] sm:$0xf] }
  0x47   : > { %1752 = vmatprep.subr.bf16.mxu1 %v1751_v5 }
  0x48   : > { %1645 = vmatpush3.bf16.msra.mxu0 %v1869_v53  ;;  %v1204_v53 = vld [vmem:[%s2356_s7 + $0x10] sm:$0xff] }
  0x49   : > { %1646 = vmatprep.subr.bf16.mxu0 %v1870_v54  ;;  %v1205_v54 = vld [vmem:[%s2356_s7 + $0x18] sm:$0x3f] }
  0x4c   : > { %1647 = vmatpush3.bf16.msra.mxu0 %v1871_v55  ;;  %v1763_v55 = vpack.c.bf16 %v1205_v54, %v1204_v53 }
  0x4d   : > { %1760 = vmatprep.subr.bf16.mxu0 %v1759_v45 }
  0x4f   : > { %953 = vmatmul.mubr.bf16.vlgmr.msra.gmra.mrb[4].mxu0 %v1873_v56  ;;  %v1571_v56 = vld [vmem:[%s2355_s6] ss:$0 sm:$0xff] }
  0x50   : > { %1762 = vmatpush3.bf16.msra.mxu0 %v1759_v45 }
  0x51   : > { %1765 = vmatprep.subr.msk.bf16.mxu0 %vm1764_vm7, %v1763_v55 }
  0x54   : > { %1768 = vmatpush3.bf16.msk.msra.mxu0 %vm1764_vm7, %v1763_v55 }
 0x102   : > { %v1604_v6 = vpop.f32.mrb[0].mxu0 }
 0x103   : > { %v1605_v8 = vpop.f32.mrb[1].mxu0 }
 0x104   : > { %v1606_v9 = vadd.f32 %v1605_v8, %v1604_v6  ;;  %v1607_v10 = vpop.f32.mrb[2].mxu0  ;;  %v1626_v11 = vpop.f32.mrb[0].mxu1 }
 0x105   : > { %v1608_v12 = vpop.f32.mrb[3].mxu0  ;;  %v1627_v15 = vpop.f32.mrb[1].mxu1 }
 0x106   : > { %v873_v13 = vadd.f32 %v1606_v9, %v1509_v7  ;;  %v1609_v14 = vadd.f32 %v1608_v12, %v1607_v10  ;;  %v1628_v16 = vadd.f32 %v1627_v15, %v1626_v11  ;;  %v1629_v17 = vpop.f32.mrb[2].mxu1  ;;  %v1397_v10 = vlaneseq  ;;  %v1578_v12 = vld [vmem:[%s2359_s10] ss:$0 sm:$0xff] }
 0x107   : > { %v1630_v19 = vpop.f32.mrb[3].mxu1 }
 0x108   : > { %v876_v18 = vadd.f32 %v1609_v14, %v1509_v7  ;;  %v914_v20 = vadd.f32 %v1628_v16, %v873_v13  ;;  %v1631_v21 = vadd.f32 %v1630_v19, %v1629_v17  ;;  %v1398_v11 = vand.u32 127, %v1397_v10 }
 0x10a   : > { %v917_v22 = vadd.f32 %v1631_v21, %v876_v18  ;;  %vm1399_vm11 = vcmp.lt.s32.totalorder %v1398_v11, 10 }
 0x10c   : > { %v995_v23 = vpop.f32.mrb[4].mxu1 }
 0x10d   : > { %v1687_v24 = vpop.f32.mrb[5].mxu1 }
 0x10e   : > { %v998_v25 = vpop.f32.mrb[6].mxu1 }
 0x10f   : > { %v1688_v26 = vpop.f32.mrb[7].mxu1 }
 0x122   : > { %v1648_v27 = vpop.f32.mrb[4].mxu0 }
 0x123   : > { %v1649_v28 = vpop.f32.mrb[5].mxu0 }
 0x124   : > { %v1650_v29 = vadd.f32 %v1649_v28, %v1648_v27  ;;  %v1651_v30 = vpop.f32.mrb[6].mxu0 }
 0x125   : > { %v1652_v31 = vpop.f32.mrb[7].mxu0 }
 0x126   : > { %v955_v32 = vadd.f32 %v1650_v29, %v914_v20  ;;  %v1653_v33 = vadd.f32 %v1652_v31, %v1651_v30 }
 0x128   : > { %v996_v34 = vadd.f32 %v995_v23, %v955_v32  ;;  %v958_v35 = vadd.f32 %v1653_v33, %v917_v22 }
 0x12a   : > { %v1002_v36 = vmax.f32 %v996_v34, 0.0  ;;  %v999_v37 = vadd.f32 %v998_v25, %v958_v35 }
 0x12c   : > { %v1003_v38 = vmax.f32 %v999_v37, 0.0  ;;  %1703 = vmatprep.mubr.msk.f32.mxu1 %vm1018_vm3, %v1002_v36 }
 0x12e   : > { %1704 = vmatmul.mubr.msk.f32.vlgmr.msra.gmra.mrb[8].mxu1 %vm1018_vm3, %v1003_v38 }
 0x12f   : > { %1754 = vmatpush3.bf16.msra.mxu1 %v1751_v5 }
 0x130   : > { %1756 = vmatprep.subr.bf16.mxu1 %v1755_v41 }
 0x133   : > { %1758 = vmatpush3.bf16.msra.mxu1 %v1755_v41 }
 0x134   : > { %1714 = vmatprep.subr.mxu1 %v1110_v42 }
 0x137   : > { %1715 = vmatpush3.msra.mxu1 %v1110_v42 }
 0x138   : > { %1770 = vmatprep.subr.bf16.mxu1 %v1769_v1 }
 0x201   : > { %v1705_v47 = vpop.f32.mrb[8].mxu1 }
 0x202   : > { %v1101_v48 = vadd.f32 %v1705_v47, %v1567_v46  ;;  %v1095_v49 = vpop.f32.mrb[9].mxu1 }
 0x203   : > { %v1096_v50 = vadd.f32 %v1567_v46, %v1095_v49 }
 0x204   : > { %v1105_v52 = vmax.f32 %v1101_v48, 0.0 }
 0x205   : > { %v1104_v51 = vmax.f32 %v1096_v50, 0.0 }
 0x207   : > { %1716 = vmatprep.mubr.msk.f32.mxu1 %vm1118_vm4, %v1104_v51 }
 0x208   : > { %1717 = vmatmul.mubr.msk.f32.vlgmr.msra.gmra.mrb[10].mxu1 %vm1118_vm4, %v1105_v52 }
 0x209   : > { %1772 = vmatpush3.bf16.msra.mxu1 %v1769_v1 }
 0x20a   : > { %1734 = vmatprep.subr.msk.mxu1 %vm1318_vm9, %v1303_v2 }
 0x20d   : > { %1735 = vmatpush3.msk.msra.mxu1 %vm1318_vm9, %v1303_v2 }
 0x2db   : > { %v1718_v57 = vpop.f32.mrb[10].mxu1 }
 0x2dc   : > { %v1197_v58 = vadd.f32 %v1718_v57, %v1571_v56  ;;  %v1191_v59 = vpop.f32.mrb[11].mxu1 }
 0x2dd   : > { %v1192_v60 = vadd.f32 %v1571_v56, %v1191_v59 }
 0x2de   : > { %v1201_v62 = vmax.f32 %v1197_v58, 0.0 }
 0x2df   : > { %v1200_v61 = vmax.f32 %v1192_v60, 0.0 }
 0x2e1   : > { %1727 = vmatprep.mubr.msk.f32.mxu0 %vm1213_vm8, %v1200_v61 }
 0x2e2   : > { %1728 = vmatmul.mubr.msk.f32.vlgmr.msra.gmra.mrb[8].mxu0 %vm1213_vm8, %v1201_v62 }
 0x3b5   : > { %v1729_v4 = vpop.f32.mrb[8].mxu0 }
 0x3b6   : > { %v1296_v5 = vadd.f32 %v1729_v4, %v1574_v3  ;;  %v1290_v6 = vpop.f32.mrb[9].mxu0 }
 0x3b7   : > { %v1291_v7 = vadd.f32 %v1574_v3, %v1290_v6 }
 0x3b8   : > { %v1300_v9 = vmax.f32 %v1296_v5, 0.0 }
 0x3b9   : > { %v1299_v8 = vmax.f32 %v1291_v7, 0.0 }
 0x3bb   : > { %1736 = vmatprep.mubr.msk.f32.mxu1 %vm1311_vm10, %v1299_v8 }
 0x3bc   : > { %1737 = vmatmul.mubr.msk.f32.vlgmr.msra.gmra.mrb[12].mxu1 %vm1311_vm10, %v1300_v9 }
 0x48f   : > { %v1738_v13 = vpop.f32.mrb[12].mxu1 }
 0x490   : > { %v1388_v14 = vpop.f32.mrb[13].mxu1  ;;  %v1394_v16 = vadd.f32 %v1738_v13, %v1578_v12 }
 0x491   : > { %v1389_v15 = vadd.f32 %v1578_v12, %v1388_v14 }
 0x492   : > { %v1401_v18 = vsel %vm1399_vm11, %v1394_v16, -inf }
 0x493   : > { %v1400_v17 = vsel %vm1399_vm11, %v1389_v15, -inf }
 0x494   : > { %1402 = vmax.xlane.f32.xlu0 %v1400_v17 }
 0x498   : > { %1404 = vmax.xlane.f32.xlu0 %v1401_v18 }
 0x521   : > { %v1403_v19 = vpop.xlane.xlu0 %1402 }
 0x522   : > { %v1406_v20 = vsub.f32 %v1389_v15, %v1403_v19 }
 0x524   : > { %v1408_v21 = vmul.f32 1.442695, %v1406_v20 }
 0x525   : > { %v1405_v22 = vpop.xlane.xlu0 %1404 }
 0x526   : > { %1877 = vpow2.f32 %v1408_v21  ;;  %v1407_v23 = vsub.f32 %v1394_v16, %v1405_v22 }
 0x528   : > { %v1410_v24 = vmul.f32 1.442695, %v1407_v23 }
 0x52a   : > { %1879 = vpow2.f32 %v1410_v24 }
 0x530   : > { %v1878_v25 = vpop.eup %1877 }
 0x531   : > { %v1412_v26 = vsel %vm1399_vm11, %v1878_v25, 0.0 }
 0x532   : > { %1414 = vadd.xlane.f32.xlu1 %v1412_v26 }
 0x534   : > { %v1880_v27 = vpop.eup %1879 }
 0x535   : > { %v1413_v28 = vsel %vm1399_vm11, %v1880_v27, 0.0 }
 0x536   : > { %1416 = vadd.xlane.f32.xlu1 %v1413_v28 }
 0x5bf   : > { %v1415_v29 = vpop.xlane.xlu1 %1414 }
 0x5c0   : > { %1881 = vlog2.f32 %v1415_v29 }
 0x5c3   : > { %v1417_v30 = vpop.xlane.xlu1 %1416 }
 0x5c4   : > { %1883 = vlog2.f32 %v1417_v30 }
 0x5ca   : > { %v1882_v31 = vpop.eup %1881 }
 0x5cb   : > { %v1419_v32 = vmul.f32 0.6931472, %v1882_v31 }
 0x5cd   : > { %v1422_v33 = vsub.f32 %v1406_v20, %v1419_v32 }
 0x5ce   : > { %v1884_v34 = vpop.eup %1883 }
 0x5cf   : > { %1424 = vst [vmem:[%s382_s29] sm:$0xff] %v1422_v33  ;;  %v1421_v35 = vmul.f32 0.6931472, %v1884_v34 }
 0x5d1   : > { %v1423_v36 = vsub.f32 %v1407_v23, %v1421_v35 }
 0x5d3   : > { %1425 = vst [vmem:[%s382_s29 + $0x8] sm:$0xff] %v1423_v36 }
 0x5d4   : > { %1898 = shalt.err (!%p1895_p3)
}
 0x5d5   : > { %s1899_s13 = scalar_lea.hbm %s2304_s14, 256  ;;  %s1903_s24 = scalar_lea.hbm %s2360_s11, 512 }
 0x5d6   : > { %p1900_p4 = scmp.ne.s32.totalorder %s2304_s14, %s1899_s13  ;;  %p1904_p9 = scmp.lt.u32.totalorder %s2304_s14, %s2360_s11 }
 0x5d7   : > { %p1905_p10 = scmp.lt.u32.totalorder %s1903_s24, %s1899_s13  ;;  %p1907_p12 = scmp.lt.u32.totalorder %s1899_s13, %s2304_s14 }
 0x5d8   : > { %p1901_p7 = pnand %p1900_p4, %p2053_p5 }
 0x5d9   : > { %p1906_p11 = por %p1905_p10, %p1904_p9 }
 0x5da   : > { %p1902_p8 = pneg %p1901_p7 }
 0x5db   : > { %p1908_p13 = por %p1907_p12, %p1906_p11 }
 0x5dd   : > { %p1909_p0 = pnand %p1908_p13, %p1902_p8 }
 0x5df   : > { %1912 = shalt.err (!%p1909_p0)
}
 0x5e0   : > { %s1953_s16 = smov 128   ;;  %s1954_s22 = smov 8  }
 0x5e1   : > { %1774 = dma.vmem_to_hbm [thread:$0]  (%p2053_p5), %s2306_s30, 256, %s2304_s14, %s2308_s15, %s1953_s16, %s1953_s16, %s1954_s22  }
 0x5e2 PF: > { %p1780_p1 = scmp.ge.s32.totalorder %s1947_s20, 2  ;;  %s1455_s25 = sand.u32 1, %s1935_s17  }
 0x5e3   : > { %s1456_s13 = scalar_lea.sflag [#allocation3], %s1455_s25 }
 0x5e4   : > { %p1777_p2 = pnand %p1780_p1, %p2057_p6 }
 0x5e6   : > { %1930 = dma.done.wait (!%p1777_p2), %s1456_s13, 256  }
 0x5e7   : > { %1932 = vsyncadd (!%p1777_p2), %s1456_s13, 4294967040  ;;  %s2364_s29 = sld [smem:[#allocation5_spill]]  ;;  %p21_p3 = scmp.ge.s32.totalorder %s2040_s23, 4  }
 0x5e8   : > { %s2365_s17 = smov %s1939_s18  ;;  %s2366_s18 = smov %s1943_s19 }
 0x5e9   : > { %s2368_s20 = smov %s2040_s23  ;;  %23 = sbr.rel (!%p21_p3) target bundleno = 3 (0x3), region = 99 }
 0x5ed   : > { %s2367_s19 = smov %s2364_s29 }
 0x5f0   :  { %1461 = vsyncpa [#allocation3], 1 }
 0x5f1   :  { %1463 = vsyncpa [#allocation3 + $0x1], 1 }

</bundles_post_ra>
